<compile_context>
chip_gen: v7x
topology: tpu7x:2x2x1
jax: 0.10.0
libtpu: 0.0.40
codegen_flags: <defaults>
</compile_context>

<pallas_src>
import functools

import jax
import jax.numpy as jnp
from jax.experimental import pallas as pl
from jax.experimental.pallas import tpu as pltpu


def _sentinel(dtype):
    """Largest representable value of dtype (never wins a min against data)."""
    dtype = jnp.dtype(dtype)
    if jnp.issubdtype(dtype, jnp.floating):
        return float(jnp.finfo(dtype).max)
    return int(jnp.iinfo(dtype).max)


def _erosion_kernel(*refs, H, W, K, col_is_input):
    """Separable KxK windowed min on a (TC, H*W) block.

    refs = (col_ref?, x_ref, o_ref):
      col_ref: (1, H*W) int32 column index (only when W is not a power of 2).
      x_ref:   (TC, H*W) image block, TC (batch*channel) rows, flat spatially.
      o_ref:   (TC, H*W) output block.
    """
    pad = K // 2
    HW = H * W

    if col_is_input:
        col_ref, x_ref, o_ref = refs
        col = col_ref[...]                                   # (1, HW) int32
    else:
        x_ref, o_ref = refs
        flat = jax.lax.broadcasted_iota(jnp.int32, (1, HW), 1)
        col = flat & (W - 1)                                 # W is a power of 2

    x = x_ref[...]
    big = _sentinel(x.dtype)

    def shifted(v, amt):
        # out[:, i] = v[:, i + amt] where defined, else the sentinel.
        rows = v.shape[0]
        fill = jnp.full((rows, abs(amt)), big, v.dtype)
        if amt > 0:
            return jnp.concatenate([v[:, amt:], fill], axis=1)
        return jnp.concatenate([fill, v[:, :HW + amt]], axis=1)

    # TODO(synk): for K >= 5 replace the per-offset loops with a log-doubling
    # (van Herk style) windowed min to cut shifts/mins to ~log2(K).

    # Pass 1: horizontal (along W) windowed min.  A flat shift of +/-d is a
    # genuine same-row neighbour iff the column stays inside [0, W): a single
    # static compare on `col` per offset (no rolled index arrays).
    h = x
    for d in range(1, pad + 1):
        h = jnp.minimum(h, jnp.where(col <= (W - 1 - d), shifted(x, d), big))
        h = jnp.minimum(h, jnp.where(col >= d, shifted(x, -d), big))

    # Pass 2: vertical (along H) windowed min of the horizontal intermediate.
    # Shifting by whole rows never crosses a row boundary, and the sentinel
    # fill covers exactly the out-of-image rows, so NO mask is needed here.
    out = h
    for d in range(1, pad + 1):
        out = jnp.minimum(out, shifted(h, d * W))
        out = jnp.minimum(out, shifted(h, -d * W))

    o_ref[...] = out.astype(o_ref.dtype)


def _pick_block_channels(nc, row_bytes, budget_bytes):
    """Rows (N*C) per block: multiple of 8 (or the full dim); the grid uses
    cdiv so a ragged last block is fine (each row is an independent image)."""
    max_rows = max(1, budget_bytes // max(1, row_bytes))
    if nc <= max_rows:
        tc = nc
    else:
        tc = (max_rows // 8) * 8
        if tc == 0:
            # One 8-sublane group is the smallest legal tile; rely on VMEM
            # headroom.  TODO(synk): strip-tile H with a (K-1)-row halo for
            # truly huge images (v7x only has 64 MiB VMEM).
            tc = min(nc, 8)
    # Prefer >= 2 parallel grid steps so both TensorCores of a v7x chip get
    # work (free ~2x there; ~0.35 us of extra per-step overhead elsewhere).
    if tc == nc and nc >= 16:
        half = (nc + 1) // 2
        tc = ((half + 7) // 8) * 8
        if tc >= nc:
            tc = nc
    return tc


def erosion(img, kernel=3):
    """Erosion / MinFilter(kernel) over an NCHW image batch."""
    assert kernel % 2 == 1, "kernel must be odd (PIL MinFilter requirement)"
    N, C, H, W = img.shape
    assert H >= kernel and W >= kernel, "image must be at least kernel x kernel"
    if kernel == 1:
        return img

    NC, HW = N * C, H * W
    x2 = img.reshape(NC, HW)  # zero-copy merge of contiguous axes

    # Generation-aware VMEM budget (v5e/v6e: 128 MiB, v7x: 64 MiB).
    try:
        vmem_cap = int(pltpu.get_tpu_info().vmem_capacity_bytes)
    except Exception:
        vmem_cap = 128 * 1024 * 1024
    vmem_limit = min(int(vmem_cap * 0.75), 100 * 1024 * 1024)
    # Budget per block: ~2x double-buffered input + 2x output + ~5 live
    # temporaries inside the kernel -> keep block <= vmem_limit / 12.
    block_budget = max(512 * 1024, min(8 * 1024 * 1024, vmem_limit // 12))

    itemsize = jnp.dtype(img.dtype).itemsize
    tc = _pick_block_channels(NC, HW * itemsize, block_budget)
    grid = (pl.cdiv(NC, tc),)

    # Column index is generated in-kernel via iota & (W-1) when W is a power
    # of two; otherwise it is streamed as one tiny (1, HW) int32 input
    # (portable: avoids relying on vector integer div/mod in the kernel).
    col_is_input = (W & (W - 1)) != 0
    kernel_fn = functools.partial(
        _erosion_kernel, H=H, W=W, K=kernel, col_is_input=col_is_input)

    data_spec = pl.BlockSpec((tc, HW), lambda i: (i, 0))
    in_specs = [data_spec]
    args = (x2,)
    if col_is_input:
        col_idx = jnp.tile(jnp.arange(W, dtype=jnp.int32), H)[None, :]
        in_specs = [pl.BlockSpec((1, HW), lambda i: (0, 0))] + in_specs
        args = (col_idx,) + args

    # TODO(synk): on v5e, sweep pipeline_mode=pl.Buffered(3) on the data
    # input/output specs once blocks are large, if DMA is still exposed.
    out2 = pl.pallas_call(
        kernel_fn,
        out_shape=jax.ShapeDtypeStruct((NC, HW), img.dtype),
        grid_spec=pltpu.PrefetchScalarGridSpec(
            num_scalar_prefetch=0,
            grid=grid,
            in_specs=in_specs,
            out_specs=pl.BlockSpec((tc, HW), lambda i: (i, 0)),
        ),
        compiler_params=pltpu.CompilerParams(
            dimension_semantics=("parallel",),
            vmem_limit_bytes=vmem_limit,
        ),
    )(*args)
    return out2.reshape(N, C, H, W)


def _erosion_ref(img, kernel=3):
    """Pure-JAX reference (edge-replicated KxK min) for correctness checking."""
    pad = kernel // 2
    padded = jnp.pad(img, ((0, 0), (0, 0), (pad, pad), (pad, pad)), mode="edge")
    N, C, H, W = img.shape
    out = None
    for dy in range(kernel):
        for dx in range(kernel):
            v = padded[:, :, dy:dy + H, dx:dx + W]
            out = v if out is None else jnp.minimum(out, v)
    return out


if __name__ == "__main__":
    key = jax.random.PRNGKey(0)
    # Small shapes consistent with an image-augmentation module.
    x = jax.random.uniform(key, (2, 4, 16, 16), dtype=jnp.float32) * 255.0

    y = erosion(x, kernel=3)
    y = jax.block_until_ready(y)

    y_ref = _erosion_ref(x, kernel=3)
    assert y.shape == (2, 4, 16, 16)
    assert jnp.allclose(y, y_ref), "Pallas erosion mismatch vs reference"

    print("KERNEL_OK")
</pallas_src>

<mosaic_0001>
module attributes {stable_mosaic.version = 11 : i64} {
  func.func @_erosion_kernel(%arg0: i32, %arg1: memref<8x256xf32, #tpu.memory_space<vmem>>, %arg2: memref<8x256xf32, #tpu.memory_space<vmem>>) attributes {dimension_semantics = [#tpu.dimension_semantics<parallel>], iteration_bounds = array<i64: 1>, scalar_prefetch = 0 : i64, scratch_operands = 0 : i64, tpu.core_type = #tpu.core_type<tc>, window_params = [{transform_indices = @transform_0, window_bounds = array<i64: 8, 256>}, {transform_indices = @transform_1, window_bounds = array<i64: 8, 256>}]} {
    %0 = tpu.iota {dimensions = array<i32: 1>} : vector<1x256xi32>
    %c15_i32 = arith.constant 15 : i32
    %1 = vector.broadcast %c15_i32 : i32 to vector<1x256xi32>
    %2 = arith.andi %0, %1 : vector<1x256xi32>
    %c0 = arith.constant 0 : index
    %c0_0 = arith.constant 0 : index
    %3 = vector.load %arg1[%c0, %c0_0] : memref<8x256xf32, #tpu.memory_space<vmem>>, vector<8x256xf32>
    %c14_i32 = arith.constant 14 : i32
    %4 = vector.broadcast %c14_i32 : i32 to vector<1x256xi32>
    %5 = arith.cmpi sle, %2, %4 : vector<1x256xi32>
    %cst = arith.constant 3.40282347E+38 : f32
    %6 = vector.broadcast %cst : f32 to vector<8x1xf32>
    %7 = vector.extract_strided_slice %3 {offsets = [0, 1], sizes = [8, 255], strides = [1, 1]} : vector<8x256xf32> to vector<8x255xf32>
    %8 = tpu.concatenate %7, %6 in 1 : vector<8x255xf32>, vector<8x1xf32> -> vector<8x256xf32>
    %cst_1 = arith.constant 3.40282347E+38 : f32
    %9 = vector.shape_cast %5 : vector<1x256xi1> to vector<1x256xi1>
    %10 = vector.broadcast %9 : vector<1x256xi1> to vector<8x256xi1>
    %11 = vector.broadcast %cst_1 : f32 to vector<8x256xf32>
    %12 = arith.select %10, %8, %11 : vector<8x256xi1>, vector<8x256xf32>
    %13 = arith.minimumf %3, %12 : vector<8x256xf32>
    %c1_i32 = arith.constant 1 : i32
    %14 = vector.broadcast %c1_i32 : i32 to vector<1x256xi32>
    %15 = arith.cmpi sge, %2, %14 : vector<1x256xi32>
    %cst_2 = arith.constant 3.40282347E+38 : f32
    %16 = vector.broadcast %cst_2 : f32 to vector<8x1xf32>
    %17 = vector.extract_strided_slice %3 {offsets = [0, 0], sizes = [8, 255], strides = [1, 1]} : vector<8x256xf32> to vector<8x255xf32>
    %18 = tpu.concatenate %16, %17 in 1 : vector<8x1xf32>, vector<8x255xf32> -> vector<8x256xf32>
    %cst_3 = arith.constant 3.40282347E+38 : f32
    %19 = vector.shape_cast %15 : vector<1x256xi1> to vector<1x256xi1>
    %20 = vector.broadcast %19 : vector<1x256xi1> to vector<8x256xi1>
    %21 = vector.broadcast %cst_3 : f32 to vector<8x256xf32>
    %22 = arith.select %20, %18, %21 : vector<8x256xi1>, vector<8x256xf32>
    %23 = arith.minimumf %13, %22 : vector<8x256xf32>
    %cst_4 = arith.constant 3.40282347E+38 : f32
    %24 = vector.broadcast %cst_4 : f32 to vector<8x16xf32>
    %25 = vector.extract_strided_slice %23 {offsets = [0, 16], sizes = [8, 240], strides = [1, 1]} : vector<8x256xf32> to vector<8x240xf32>
    %26 = tpu.concatenate %25, %24 in 1 : vector<8x240xf32>, vector<8x16xf32> -> vector<8x256xf32>
    %27 = arith.minimumf %23, %26 : vector<8x256xf32>
    %cst_5 = arith.constant 3.40282347E+38 : f32
    %28 = vector.broadcast %cst_5 : f32 to vector<8x16xf32>
    %29 = vector.extract_strided_slice %23 {offsets = [0, 0], sizes = [8, 240], strides = [1, 1]} : vector<8x256xf32> to vector<8x240xf32>
    %30 = tpu.concatenate %28, %29 in 1 : vector<8x16xf32>, vector<8x240xf32> -> vector<8x256xf32>
    %31 = arith.minimumf %27, %30 : vector<8x256xf32>
    %c0_6 = arith.constant 0 : index
    %c0_7 = arith.constant 0 : index
    %32 = vector.load %arg2[%c0_6, %c0_7] : memref<8x256xf32, #tpu.memory_space<vmem>>, vector<8x256xf32>
    tpu.vector_store %arg2[%c0_6, %c0_7], %31 {strides = array<i32>} : memref<8x256xf32, #tpu.memory_space<vmem>>, vector<8x256xf32>,
    return
  }
  func.func @transform_0(%arg0: i32) -> (i32, i32) {
    %c0_i32 = arith.constant 0 : i32
    %c0_i32_0 = arith.constant 0 : i32
    return %arg0, %c0_i32 : i32, i32
  }
  func.func @transform_1(%arg0: i32) -> (i32, i32) {
    %c0_i32 = arith.constant 0 : i32
    %c0_i32_0 = arith.constant 0 : i32
    return %arg0, %c0_i32 : i32, i32
  }
}

</mosaic_0001>

<bundles_post_ra>
// kernel: tpu_custom_call.1
= control target key start
LH: loop header
LB: loop body
LE: loop exit
PB: predicated region body
PF: predicated region fallthrough
CT: control target
= control target key end

     0   :  { %6 = vsyncpa [#allocation3], 0  ;;  %s203_s0 = inlined_call_operand.hbm [shape: f32[8,256], index: 0, kind: input, shape index: {}]   ;;  %s204_s1 = inlined_call_operand.hbm [shape: f32[8,256], index: 1, kind: output, shape index: {}]  }
   0x1   :  { %7 = vsyncpa [#allocation4], 0  ;;  %s163_s6 = smov [#allocation2]   ;;  %s115_s10 = scalar_lea.hbm %s203_s0, 256 }
   0x2   :  { %s14_s7 = sshll.u32 %s163_s6, 4  ;;  %p116_p0 = scmp.ne.s32.totalorder %s203_s0, %s115_s10  ;;  %s15_s7 = int_to_ptr.vmem [resolvable:$true] %s14_s7 }
   0x3   :  { %p119_p1 = scmp.lt.u32.totalorder %s115_s10, %s203_s0 }
   0x5   :  { %p121_p2 = pnand %p119_p1, %p116_p0 }
   0x7   :  { %124 = shalt.err (!%p121_p2)
}
   0x8   :  { %s125_s15 = scalar_lea.vmem %s15_s7, 256  ;;  %p130_p4 = scmp.lt.s32.totalorder %s15_s7, %s15_s7 }
   0x9   :  { %p126_p3 = scmp.ne.s32.totalorder %s15_s7, %s125_s15  ;;  %p131_p5 = scmp.lt.s32.totalorder %s125_s15, %s125_s15 }
   0xb   :  { %p132_p6 = por %p131_p5, %p130_p4 }
   0xd   :  { %p133_p7 = pnand %p132_p6, %p126_p3 }
   0xf   :  { %136 = shalt.err (!%p133_p7)
}
  0x10   :  { %17 = dma.hbm_to_vmem [thread:$0]  %s203_s0, 256, %s15_s7, [#allocation3]  }
  0x11   :  { %159 = dma.done.wait [#allocation3], 256  }
  0x12   :  { %160 = vsyncadd [#allocation3], 4294967040  ;;  %v26_v0 = vld [vmem:[#allocation2] sm:$0xff]  ;;  %s164_s18 = smov 1   ;;  %s165_s19 = smov 127   ;;  %v27_v1 = vld [vmem:[#allocation2 + $0x8] sm:$0xff]  ;;  %v21_v2 = vlaneseq }
  0x13   :  { %51 = vrot.lane.b32.xlu1 %v26_v0, %s164_s18  ;;  %32 = vrot.lane.b32.xlu0 %v26_v0, %s165_s19  ;;  %vm55_vm0 = vcmask 7168   ;;  %vm36_vm1 = vcmask 1039360   ;;  %s166_s0 = smov 112   ;;  %s167_s20 = smov 16   ;;  %vm74_vm6 = vcmask 916480   ;;  %vm85_vm7 = vcmask 130048  }
  0x14   :  { %v22_v3 = vand.u32 127, %v21_v2  ;;  %s168_s21 = smov [#allocation5]  }
  0x15   :  { %s100_s22 = sshll.u32 %s168_s21, 4  ;;  %s101_s22 = int_to_ptr.vmem [resolvable:$true] %s100_s22 }
  0x16   :  { %v23_v4 = vadd.s32 128, %v22_v3  ;;  %v24_v6 = vand.u32 15, %v22_v3  ;;  %s137_s23 = scalar_lea.vmem %s101_s22, 256  ;;  %p142_p9 = scmp.lt.s32.totalorder %s101_s22, %s101_s22 }
  0x17   :  { %53 = vrot.lane.b32.xlu1 %v27_v1, %s164_s18  ;;  %34 = vrot.lane.b32.xlu0 %v27_v1, %s165_s19  ;;  %p138_p8 = scmp.ne.s32.totalorder %s101_s22, %s137_s23  ;;  %p143_p10 = scmp.lt.s32.totalorder %s137_s23, %s137_s23 }
  0x18   :  { %v25_v5 = vand.u32 15, %v23_v4  ;;  %vm28_vm2 = vcmp.le.s32.totalorder %v24_v6, 14  ;;  %vm49_vm4 = vcmp.ge.s32.totalorder %v24_v6, 1 }
  0x19   :  { %p144_p11 = por %p143_p10, %p142_p9 }
  0x1a   :  { %vm29_vm3 = vcmp.le.s32.totalorder %v25_v5, 14  ;;  %vm50_vm5 = vcmp.ge.s32.totalorder %v25_v5, 1 }
  0x1b   :  { %p145_p12 = pnand %p144_p11, %p138_p8 }
  0x85   :  { %v52_v7 = vpop.permute.xlu1 %51  ;;  %v33_v8 = vpop.permute.xlu0 %32 }
  0x86   :  { %v59_v11 = vsel %vm55_vm0, 3.4028235e+38, %v52_v7 }
  0x87   :  { %v64_v19 = vsel %vm49_vm4, %v59_v11, 3.4028235e+38 }
  0x89   :  { %v54_v9 = vpop.permute.xlu1 %53  ;;  %v35_v10 = vpop.permute.xlu0 %34 }
  0x8a   :  { %v56_v12 = vsel %vm55_vm0, %v52_v7, %v54_v9  ;;  %v37_v13 = vsel %vm36_vm1, %v33_v8, %v35_v10  ;;  %v40_v14 = vsel %vm36_vm1, %v35_v10, 3.4028235e+38 }
  0x8b   :  { %v45_v15 = vsel %vm28_vm2, %v37_v13, 3.4028235e+38  ;;  %v46_v16 = vsel %vm29_vm3, %v40_v14, 3.4028235e+38  ;;  %v65_v20 = vsel %vm50_vm5, %v56_v12, 3.4028235e+38 }
  0x8c   :  { %v47_v17 = vmin.f32 %v26_v0, %v45_v15  ;;  %v48_v18 = vmin.f32 %v27_v1, %v46_v16 }
  0x8e   :  { %v67_v21 = vmin.f32 %v48_v18, %v65_v20  ;;  %v66_v22 = vmin.f32 %v47_v17, %v64_v19 }
  0x90   :  { %72 = vrot.lane.b32.xlu1 %v67_v21, %s166_s0  ;;  %70 = vrot.lane.b32.xlu0 %v66_v22, %s166_s0 }
  0x94   :  { %83 = vrot.lane.b32.xlu1 %v67_v21, %s167_s20  ;;  %81 = vrot.lane.b32.xlu0 %v66_v22, %s167_s20 }
 0x102   :  { %v73_v23 = vpop.permute.xlu1 %72  ;;  %v71_v24 = vpop.permute.xlu0 %70 }
 0x103   :  { %v78_v25 = vsel %vm74_vm6, %v73_v23, 3.4028235e+38  ;;  %v75_v26 = vsel %vm74_vm6, %v71_v24, %v73_v23 }
 0x104   :  { %v80_v27 = vmin.f32 %v67_v21, %v78_v25  ;;  %v79_v28 = vmin.f32 %v66_v22, %v75_v26 }
 0x106   :  { %v84_v29 = vpop.permute.xlu1 %83  ;;  %v82_v30 = vpop.permute.xlu0 %81 }
 0x107   :  { %v86_v31 = vsel %vm85_vm7, %v82_v30, %v84_v29  ;;  %v89_v32 = vsel %vm85_vm7, 3.4028235e+38, %v82_v30 }
 0x108   :  { %v90_v33 = vmin.f32 %v79_v28, %v89_v32  ;;  %v91_v34 = vmin.f32 %v80_v27, %v86_v31 }
 0x10a   :  { %92 = vst [vmem:[#allocation5] sm:$0xff] %v90_v33  ;;  %93 = vst [vmem:[#allocation5 + $0x8] sm:$0xff] %v91_v34 }
 0x10b   :  { %148 = shalt.err (!%p145_p12)
}
 0x10c   :  { %s149_s26 = scalar_lea.hbm %s204_s1, 256 }
 0x10d   :  { %p150_p13 = scmp.ne.s32.totalorder %s204_s1, %s149_s26  ;;  %p153_p0 = scmp.lt.u32.totalorder %s149_s26, %s204_s1 }
 0x10f   :  { %p155_p1 = pnand %p153_p0, %p150_p13 }
 0x111   :  { %158 = shalt.err (!%p155_p1)
}
 0x112   :  { %103 = dma.vmem_to_hbm [thread:$0]  %s101_s22, 256, %s204_s1, [#allocation4]  }
 0x113   :  { %161 = dma.done.wait [#allocation4], 256  }
 0x114   :  { %162 = vsyncadd [#allocation4], 4294967040 }
 0x115   :  { %107 = vsyncpa [#allocation3], 1 }
 0x116   :  { %108 = vsyncpa [#allocation4], 1 }

</bundles_post_ra>
